<compile_context>
chip_gen: v7x
topology: tpu7x:2x2x1
jax: 0.10.0
libtpu: 0.0.40
codegen_flags: <defaults>
</compile_context>

<pallas_src>
import functools

import jax
import jax.numpy as jnp
from jax.experimental import pallas as pl
from jax.experimental.pallas import tpu as pltpu


def _head_kernel(x_ref, w1_ref, b1_ref, w2_ref, b2_ref, o_ref, *, H, W):
    """One batch element per grid step.

    x_ref  : (1, C, H*W)   bf16, flattened NCHW image (no padding)
    w1_ref : (C, 9*C)      bf16, 3x3 weights, tap-major columns (k=dy*3+dx), BN scale folded
    b1_ref : (C, 1)        f32,  folded BN bias ((conv_bias - mean)*scale + beta)
    w2_ref : (Cout, C)     bf16, 1x1 conv weights
    b2_ref : (Cout, 1)     f32,  1x1 conv bias
    o_ref  : (1, Cout, H*W) f32
    """
    HW = H * W
    xf = x_ref[0].astype(jnp.float32)                 # (C, HW) in vregs
    C = xf.shape[0]

    # lane-position helpers for boundary masks (replaces zero padding)
    pos = jax.lax.broadcasted_iota(jnp.int32, (C, HW), 1)
    if (W & (W - 1)) == 0:                            # W is a power of two here
        col = jnp.bitwise_and(pos, W - 1)
    else:                                             # fallback (unused in this config)
        col = pos % W

    # im2col: 9 circularly-shifted copies of the flat image, boundary-masked,
    # stacked along channels -> one K = 9*C matmul on the MXU.
    patches = []
    for dy in range(3):
        for dx in range(3):
            s = (dy - 1) * W + (dx - 1)               # flat shift of this tap
            shifted = xf if s == 0 else pltpu.roll(xf, (-s) % HW, 1)
            conds = []
            if dy == 0:
                conds.append(pos >= W)                # needs row i-1  -> i >= 1
            if dy == 2:
                conds.append(pos < (H - 1) * W)       # needs row i+1  -> i <= H-2
            if dx == 0:
                conds.append(col >= 1)                # needs col j-1  -> j >= 1
            if dx == 2:
                conds.append(col < (W - 1))           # needs col j+1  -> j <= W-2
            if conds:
                m = conds[0]
                for c in conds[1:]:
                    m = jnp.logical_and(m, c)
                shifted = jnp.where(m, shifted, 0.0)
            patches.append(shifted.astype(jnp.bfloat16))
    patches = jnp.concatenate(patches, axis=0)        # (9*C, HW) bf16

    # 3x3 conv (+ folded BN scale) as one MXU matmul, f32 accumulate.
    acc = jnp.dot(w1_ref[...], patches, preferred_element_type=jnp.float32)  # (C, HW)

    # folded BN bias + ReLU (f32 epilogue)
    y = jnp.maximum(acc + b1_ref[...], 0.0)

    # 1x1 conv, transposed so the output stays lane-dense: (Cout, HW)
    out = jnp.dot(w2_ref[...], y.astype(jnp.bfloat16),
                  preferred_element_type=jnp.float32) + b2_ref[...]
    o_ref[0] = out.astype(o_ref.dtype)


def single_regression_head(x_nchw, params):
    """x_nchw: (N, C, H, W) float32, PyTorch layout.  Returns (N, Cout, H, W) float32."""
    w1, conv1_b = params["w1"], params["b1"]
    gamma, beta = params["gamma"], params["beta"]
    run_mean, run_var = params["running_mean"], params["running_var"]
    w2, b2 = params["w2"], params["b2"]
    eps = 1e-5

    N, C, H, W = x_nchw.shape
    Cout = w2.shape[0]
    HW = H * W

    # ---- wrapper glue: BN folding + dtype casts (no pads, no transposes) ----
    scale = gamma / jnp.sqrt(run_var + eps)                           # (C,)
    # w1: (Cout=C, Cin=C, 3, 3) -> (C, 9*C), columns ordered (k=dy*3+dx, c_in),
    # with the BN scale folded into the output-channel rows.
    w1s = (jnp.transpose(w1, (0, 2, 3, 1)).reshape(C, 9 * C)
           * scale[:, None]).astype(jnp.bfloat16)
    b1f = ((conv1_b - run_mean) * scale + beta).reshape(C, 1).astype(jnp.float32)
    w2t = w2.reshape(Cout, C).astype(jnp.bfloat16)
    b2f = b2.reshape(Cout, 1).astype(jnp.float32)

    xf = x_nchw.reshape(N, C, HW).astype(jnp.bfloat16)                # free reshape + cast

    kernel = functools.partial(_head_kernel, H=H, W=W)

    out_flat = pl.pallas_call(
        kernel,
        out_shape=jax.ShapeDtypeStruct((N, Cout, HW), jnp.float32),
        grid_spec=pltpu.PrefetchScalarGridSpec(
            num_scalar_prefetch=0,
            grid=(N,),
            in_specs=[
                pl.BlockSpec((1, C, HW), lambda n: (n, 0, 0)),
                pl.BlockSpec((C, 9 * C), lambda n: (0, 0)),
                pl.BlockSpec((C, 1), lambda n: (0, 0)),
                pl.BlockSpec((Cout, C), lambda n: (0, 0)),
                pl.BlockSpec((Cout, 1), lambda n: (0, 0)),
            ],
            out_specs=pl.BlockSpec((1, Cout, HW), lambda n: (n, 0, 0)),
        ),
        compiler_params=pltpu.CompilerParams(
            dimension_semantics=("parallel",)),
    )(xf, w1s, b1f, w2t, b2f)

    return out_flat.reshape(N, Cout, H, W)                            # free reshape


def reference(x, params):
    """Plain-JAX reference (eval-mode BN), f32."""
    eps = 1e-5
    dn = ("NCHW", "OIHW", "NCHW")
    y = jax.lax.conv_general_dilated(x, params["w1"], (1, 1), "SAME",
                                     dimension_numbers=dn)
    y = y + params["b1"][None, :, None, None]
    scale = params["gamma"] / jnp.sqrt(params["running_var"] + eps)
    y = (y - params["running_mean"][None, :, None, None]) * scale[None, :, None, None] \
        + params["beta"][None, :, None, None]
    y = jnp.maximum(y, 0.0)
    z = jax.lax.conv_general_dilated(y, params["w2"], (1, 1), "VALID",
                                     dimension_numbers=dn)
    return z + params["b2"][None, :, None, None]


def init_params(key, channel, cout):
    ks = jax.random.split(key, 8)
    return {
        # Conv2d(channel, channel, 3): weight (Cout, Cin, 3, 3), bias (Cout,)
        "w1": jax.random.normal(ks[0], (channel, channel, 3, 3), jnp.float32) * 0.05,
        "b1": jax.random.normal(ks[1], (channel,), jnp.float32) * 0.05,
        # BatchNorm2d(channel) eval-mode parameters / running stats
        "gamma": 1.0 + 0.1 * jax.random.normal(ks[2], (channel,), jnp.float32),
        "beta": 0.1 * jax.random.normal(ks[3], (channel,), jnp.float32),
        "running_mean": 0.1 * jax.random.normal(ks[4], (channel,), jnp.float32),
        "running_var": 1.0 + 0.1 * jax.random.uniform(ks[5], (channel,), jnp.float32),
        # Conv2d(channel, cout, 1): weight (Cout, Cin, 1, 1), bias (Cout,)
        "w2": jax.random.normal(ks[6], (cout, channel, 1, 1), jnp.float32) * 0.05,
        "b2": jax.random.normal(ks[7], (cout,), jnp.float32) * 0.05,
    }


if __name__ == "__main__":
    # config: use_map=False, use_vis=False -> channel=32; binary=True, only_det=True
    # anchor_num_per_loc=2, box_code_size=6, out_seq_len=1 -> Cout = 12
    channel = 32
    anchor_num_per_loc = 2
    box_code_size = 6
    out_seq_len = 1
    cout = anchor_num_per_loc * box_code_size * out_seq_len

    N, H, W = 2, 16, 16

    key = jax.random.PRNGKey(0)
    kx, kp = jax.random.split(key)
    x = jax.random.normal(kx, (N, channel, H, W), jnp.float32)   # NCHW like PyTorch
    params = init_params(kp, channel, cout)

    out = single_regression_head(x, params)
    jax.block_until_ready(out)
    assert out.shape == (N, cout, H, W), out.shape

    ref = reference(x, params)
    err = float(jnp.max(jnp.abs(out - ref)))
    assert err < 0.1, f"max abs err vs reference: {err}"   # bf16 MXU tolerance

    print("KERNEL_OK")
</pallas_src>

<mosaic_0001>
module attributes {stable_mosaic.version = 11 : i64} {
  func.func @_head_kernel(%arg0: i32, %arg1: memref<1x32x256xbf16, #tpu.memory_space<vmem>>, %arg2: memref<32x288xbf16, #tpu.memory_space<vmem>>, %arg3: memref<32x1xf32, #tpu.memory_space<vmem>>, %arg4: memref<12x32xbf16, #tpu.memory_space<vmem>>, %arg5: memref<12x1xf32, #tpu.memory_space<vmem>>, %arg6: memref<1x12x256xf32, #tpu.memory_space<vmem>>) attributes {dimension_semantics = [#tpu.dimension_semantics<parallel>], iteration_bounds = array<i64: 2>, scalar_prefetch = 0 : i64, scratch_operands = 0 : i64, tpu.core_type = #tpu.core_type<tc>, window_params = [{transform_indices = @transform_0, window_bounds = array<i64: 1, 32, 256>}, {pipeline_mode = #tpu.pipeline_mode<synchronous>, transform_indices = @transform_1, window_bounds = array<i64: 32, 288>}, {pipeline_mode = #tpu.pipeline_mode<synchronous>, transform_indices = @transform_2, window_bounds = array<i64: 32, 1>}, {pipeline_mode = #tpu.pipeline_mode<synchronous>, transform_indices = @transform_3, window_bounds = array<i64: 12, 32>}, {pipeline_mode = #tpu.pipeline_mode<synchronous>, transform_indices = @transform_4, window_bounds = array<i64: 12, 1>}, {transform_indices = @transform_5, window_bounds = array<i64: 1, 12, 256>}]} {
    %c0 = arith.constant 0 : index
    %c0_0 = arith.constant 0 : index
    %c0_1 = arith.constant 0 : index
    %0 = vector.load %arg1[%c0, %c0_0, %c0_1] : memref<1x32x256xbf16, #tpu.memory_space<vmem>>, vector<1x32x256xbf16>
    %1 = vector.shape_cast %0 : vector<1x32x256xbf16> to vector<32x256xbf16>
    %2 = arith.extf %1 : vector<32x256xbf16> to vector<32x256xf32>
    %3 = tpu.iota {dimensions = array<i32: 1>} : vector<32x256xi32>
    %c15_i32 = arith.constant 15 : i32
    %4 = vector.broadcast %c15_i32 : i32 to vector<32x256xi32>
    %5 = arith.andi %3, %4 : vector<32x256xi32>
    %c17_i32 = arith.constant 17 : i32
    %6 = tpu.dynamic_rotate %2 by %c17_i32 dim 1 : vector<32x256xf32>, i32 -> vector<32x256xf32>
    %c16_i32 = arith.constant 16 : i32
    %7 = vector.broadcast %c16_i32 : i32 to vector<32x256xi32>
    %8 = arith.cmpi sge, %3, %7 : vector<32x256xi32>
    %c1_i32 = arith.constant 1 : i32
    %9 = vector.broadcast %c1_i32 : i32 to vector<32x256xi32>
    %10 = arith.cmpi sge, %5, %9 : vector<32x256xi32>
    %11 = arith.andi %8, %10 : vector<32x256xi1>
    %cst = arith.constant 0.000000e+00 : f32
    %12 = vector.broadcast %cst : f32 to vector<32x256xf32>
    %13 = arith.select %11, %6, %12 : vector<32x256xi1>, vector<32x256xf32>
    %14 = arith.truncf %13 : vector<32x256xf32> to vector<32x256xbf16>
    %c16_i32_2 = arith.constant 16 : i32
    %15 = tpu.dynamic_rotate %2 by %c16_i32_2 dim 1 : vector<32x256xf32>, i32 -> vector<32x256xf32>
    %c16_i32_3 = arith.constant 16 : i32
    %16 = vector.broadcast %c16_i32_3 : i32 to vector<32x256xi32>
    %17 = arith.cmpi sge, %3, %16 : vector<32x256xi32>
    %cst_4 = arith.constant 0.000000e+00 : f32
    %18 = vector.broadcast %cst_4 : f32 to vector<32x256xf32>
    %19 = arith.select %17, %15, %18 : vector<32x256xi1>, vector<32x256xf32>
    %20 = arith.truncf %19 : vector<32x256xf32> to vector<32x256xbf16>
    %c15_i32_5 = arith.constant 15 : i32
    %21 = tpu.dynamic_rotate %2 by %c15_i32_5 dim 1 : vector<32x256xf32>, i32 -> vector<32x256xf32>
    %c16_i32_6 = arith.constant 16 : i32
    %22 = vector.broadcast %c16_i32_6 : i32 to vector<32x256xi32>
    %23 = arith.cmpi sge, %3, %22 : vector<32x256xi32>
    %c15_i32_7 = arith.constant 15 : i32
    %24 = vector.broadcast %c15_i32_7 : i32 to vector<32x256xi32>
    %25 = arith.cmpi slt, %5, %24 : vector<32x256xi32>
    %26 = arith.andi %23, %25 : vector<32x256xi1>
    %cst_8 = arith.constant 0.000000e+00 : f32
    %27 = vector.broadcast %cst_8 : f32 to vector<32x256xf32>
    %28 = arith.select %26, %21, %27 : vector<32x256xi1>, vector<32x256xf32>
    %29 = arith.truncf %28 : vector<32x256xf32> to vector<32x256xbf16>
    %c1_i32_9 = arith.constant 1 : i32
    %30 = tpu.dynamic_rotate %2 by %c1_i32_9 dim 1 : vector<32x256xf32>, i32 -> vector<32x256xf32>
    %c1_i32_10 = arith.constant 1 : i32
    %31 = vector.broadcast %c1_i32_10 : i32 to vector<32x256xi32>
    %32 = arith.cmpi sge, %5, %31 : vector<32x256xi32>
    %cst_11 = arith.constant 0.000000e+00 : f32
    %33 = vector.broadcast %cst_11 : f32 to vector<32x256xf32>
    %34 = arith.select %32, %30, %33 : vector<32x256xi1>, vector<32x256xf32>
    %35 = arith.truncf %34 : vector<32x256xf32> to vector<32x256xbf16>
    %36 = arith.truncf %2 : vector<32x256xf32> to vector<32x256xbf16>
    %c255_i32 = arith.constant 255 : i32
    %37 = tpu.dynamic_rotate %2 by %c255_i32 dim 1 : vector<32x256xf32>, i32 -> vector<32x256xf32>
    %c15_i32_12 = arith.constant 15 : i32
    %38 = vector.broadcast %c15_i32_12 : i32 to vector<32x256xi32>
    %39 = arith.cmpi slt, %5, %38 : vector<32x256xi32>
    %cst_13 = arith.constant 0.000000e+00 : f32
    %40 = vector.broadcast %cst_13 : f32 to vector<32x256xf32>
    %41 = arith.select %39, %37, %40 : vector<32x256xi1>, vector<32x256xf32>
    %42 = arith.truncf %41 : vector<32x256xf32> to vector<32x256xbf16>
    %c241_i32 = arith.constant 241 : i32
    %43 = tpu.dynamic_rotate %2 by %c241_i32 dim 1 : vector<32x256xf32>, i32 -> vector<32x256xf32>
    %c240_i32 = arith.constant 240 : i32
    %44 = vector.broadcast %c240_i32 : i32 to vector<32x256xi32>
    %45 = arith.cmpi slt, %3, %44 : vector<32x256xi32>
    %c1_i32_14 = arith.constant 1 : i32
    %46 = vector.broadcast %c1_i32_14 : i32 to vector<32x256xi32>
    %47 = arith.cmpi sge, %5, %46 : vector<32x256xi32>
    %48 = arith.andi %45, %47 : vector<32x256xi1>
    %cst_15 = arith.constant 0.000000e+00 : f32
    %49 = vector.broadcast %cst_15 : f32 to vector<32x256xf32>
    %50 = arith.select %48, %43, %49 : vector<32x256xi1>, vector<32x256xf32>
    %51 = arith.truncf %50 : vector<32x256xf32> to vector<32x256xbf16>
    %c240_i32_16 = arith.constant 240 : i32
    %52 = tpu.dynamic_rotate %2 by %c240_i32_16 dim 1 : vector<32x256xf32>, i32 -> vector<32x256xf32>
    %c240_i32_17 = arith.constant 240 : i32
    %53 = vector.broadcast %c240_i32_17 : i32 to vector<32x256xi32>
    %54 = arith.cmpi slt, %3, %53 : vector<32x256xi32>
    %cst_18 = arith.constant 0.000000e+00 : f32
    %55 = vector.broadcast %cst_18 : f32 to vector<32x256xf32>
    %56 = arith.select %54, %52, %55 : vector<32x256xi1>, vector<32x256xf32>
    %57 = arith.truncf %56 : vector<32x256xf32> to vector<32x256xbf16>
    %c239_i32 = arith.constant 239 : i32
    %58 = tpu.dynamic_rotate %2 by %c239_i32 dim 1 : vector<32x256xf32>, i32 -> vector<32x256xf32>
    %c240_i32_19 = arith.constant 240 : i32
    %59 = vector.broadcast %c240_i32_19 : i32 to vector<32x256xi32>
    %60 = arith.cmpi slt, %3, %59 : vector<32x256xi32>
    %c15_i32_20 = arith.constant 15 : i32
    %61 = vector.broadcast %c15_i32_20 : i32 to vector<32x256xi32>
    %62 = arith.cmpi slt, %5, %61 : vector<32x256xi32>
    %63 = arith.andi %60, %62 : vector<32x256xi1>
    %cst_21 = arith.constant 0.000000e+00 : f32
    %64 = vector.broadcast %cst_21 : f32 to vector<32x256xf32>
    %65 = arith.select %63, %58, %64 : vector<32x256xi1>, vector<32x256xf32>
    %66 = arith.truncf %65 : vector<32x256xf32> to vector<32x256xbf16>
    %67 = tpu.concatenate %14, %20, %29, %35, %36, %42, %51, %57, %66 in 0 : vector<32x256xbf16>, vector<32x256xbf16>, vector<32x256xbf16>, vector<32x256xbf16>, vector<32x256xbf16>, vector<32x256xbf16>, vector<32x256xbf16>, vector<32x256xbf16>, vector<32x256xbf16> -> vector<288x256xbf16>
    %c0_22 = arith.constant 0 : index
    %c0_23 = arith.constant 0 : index
    %68 = vector.load %arg2[%c0_22, %c0_23] : memref<32x288xbf16, #tpu.memory_space<vmem>>, vector<32x288xbf16>
    %cst_24 = arith.constant dense<0.000000e+00> : vector<32x256xf32>
    %69 = tpu.matmul %68, %67, %cst_24 {dimension_numbers = #tpu.dot_dimension_numbers<[1], [0], [0], [1], [0, 0, 1, 1], [], []>} : vector<32x288xbf16>, vector<288x256xbf16>, vector<32x256xf32> -> vector<32x256xf32>
    %c0_25 = arith.constant 0 : index
    %c0_26 = arith.constant 0 : index
    %70 = vector.load %arg3[%c0_25, %c0_26] : memref<32x1xf32, #tpu.memory_space<vmem>>, vector<32x1xf32>
    %71 = vector.broadcast %70 : vector<32x1xf32> to vector<32x256xf32>
    %72 = arith.addf %69, %71 : vector<32x256xf32>
    %cst_27 = arith.constant 0.000000e+00 : f32
    %73 = vector.broadcast %cst_27 : f32 to vector<32x256xf32>
    %74 = arith.maximumf %72, %73 : vector<32x256xf32>
    %c0_28 = arith.constant 0 : index
    %c0_29 = arith.constant 0 : index
    %75 = vector.load %arg4[%c0_28, %c0_29] : memref<12x32xbf16, #tpu.memory_space<vmem>>, vector<12x32xbf16>
    %76 = arith.truncf %74 : vector<32x256xf32> to vector<32x256xbf16>
    %cst_30 = arith.constant dense<0.000000e+00> : vector<12x256xf32>
    %77 = tpu.matmul %75, %76, %cst_30 {dimension_numbers = #tpu.dot_dimension_numbers<[1], [0], [0], [1], [0, 0, 1, 1], [], []>} : vector<12x32xbf16>, vector<32x256xbf16>, vector<12x256xf32> -> vector<12x256xf32>
    %c0_31 = arith.constant 0 : index
    %c0_32 = arith.constant 0 : index
    %78 = vector.load %arg5[%c0_31, %c0_32] : memref<12x1xf32, #tpu.memory_space<vmem>>, vector<12x1xf32>
    %79 = vector.broadcast %78 : vector<12x1xf32> to vector<12x256xf32>
    %80 = arith.addf %77, %79 : vector<12x256xf32>
    %c0_33 = arith.constant 0 : index
    %c0_34 = arith.constant 0 : index
    %c0_35 = arith.constant 0 : index
    %81 = vector.load %arg6[%c0_33, %c0_34, %c0_35] : memref<1x12x256xf32, #tpu.memory_space<vmem>>, vector<1x12x256xf32>
    %82 = vector.shape_cast %81 : vector<1x12x256xf32> to vector<12x256xf32>
    %83 = vector.shape_cast %80 : vector<12x256xf32> to vector<1x12x256xf32>
    tpu.vector_store %arg6[%c0_33, %c0_34, %c0_35], %83 {strides = array<i32>} : memref<1x12x256xf32, #tpu.memory_space<vmem>>, vector<1x12x256xf32>,
    return
  }
  func.func @transform_0(%arg0: i32) -> (i32, i32, i32) {
    %c0_i32 = arith.constant 0 : i32
    %c0_i32_0 = arith.constant 0 : i32
    %c0_i32_1 = arith.constant 0 : i32
    return %arg0, %c0_i32, %c0_i32_0 : i32, i32, i32
  }
  func.func @transform_1(%arg0: i32) -> (i32, i32) {
    %c0_i32 = arith.constant 0 : i32
    %c0_i32_0 = arith.constant 0 : i32
    %c0_i32_1 = arith.constant 0 : i32
    return %c0_i32, %c0_i32_0 : i32, i32
  }
  func.func @transform_2(%arg0: i32) -> (i32, i32) {
    %c0_i32 = arith.constant 0 : i32
    %c0_i32_0 = arith.constant 0 : i32
    %c0_i32_1 = arith.constant 0 : i32
    return %c0_i32, %c0_i32_0 : i32, i32
  }
  func.func @transform_3(%arg0: i32) -> (i32, i32) {
    %c0_i32 = arith.constant 0 : i32
    %c0_i32_0 = arith.constant 0 : i32
    %c0_i32_1 = arith.constant 0 : i32
    return %c0_i32, %c0_i32_0 : i32, i32
  }
  func.func @transform_4(%arg0: i32) -> (i32, i32) {
    %c0_i32 = arith.constant 0 : i32
    %c0_i32_0 = arith.constant 0 : i32
    %c0_i32_1 = arith.constant 0 : i32
    return %c0_i32, %c0_i32_0 : i32, i32
  }
  func.func @transform_5(%arg0: i32) -> (i32, i32, i32) {
    %c0_i32 = arith.constant 0 : i32
    %c0_i32_0 = arith.constant 0 : i32
    %c0_i32_1 = arith.constant 0 : i32
    return %arg0, %c0_i32, %c0_i32_0 : i32, i32, i32
  }
}

</mosaic_0001>

<bundles_post_ra>
// kernel: tpu_custom_call.1
= control target key start
LH: loop header
LB: loop body
LE: loop exit
PB: predicated region body
PF: predicated region fallthrough
CT: control target
= control target key end

     0   :  { %10 = vsyncpa [#allocation3], 0  ;;  %s1921_s0 = inlined_call_operand.hbm [shape: bf16[2,32,256], index: 0, kind: input, shape index: {}]   ;;  %s1922_s1 = inlined_call_operand.vmem [shape: bf16[32,288], index: 1, kind: input, shape index: {}]   ;;  %s1923_s2 = inlined_call_operand.vmem [shape: f32[32,1], index: 2, kind: input, shape index: {}]   ;;  %s1924_s3 = inlined_call_operand.vmem [shape: bf16[12,32], index: 3, kind: input, shape index: {}]   ;;  %s1925_s4 = inlined_call_operand.vmem [shape: f32[12,1], index: 4, kind: input, shape index: {}]   ;;  %s1926_s5 = inlined_call_operand.vmem [shape: f32[2,12,256], index: 5, kind: output, shape index: {}]  }
   0x1   :  { %12 = vsyncpa [#allocation3 + $0x1], 0  ;;  %s1379_s18 = smov 0   ;;  %s1381_s19 = smov 0  }
   0x2   :  { %s1383_s20 = smov 0   ;;  %s1385_s21 = smov 0  }
   0x3 LB: > { %s1398_s22 = sadd.s32 4294967295, %s1335_s21   ;;  %s1401_s23 = sadd.s32 1, %s1335_s21   ;;  %s1335_s21 = sphi %s1385_s21, %s1961_s21   ;;  %s1331_s20 = sphi %s1383_s20, %s1960_s20   ;;  %s1327_s19 = sphi %s1381_s19, %s1959_s19   ;;  %s1323_s18 = sphi %s1379_s18, %s1958_s18  }
   0x4   : > { %s22_s24 = ssub.s32 %s1335_s21, %s1401_s23  ;;  %s25_s25 = sadd.s32 1, %s1331_s20 }
   0x5   : > { %p23_p0 = scmp.eq.s32.totalorder %s22_s24, 0  ;;  %p32_p1 = scmp.ne.s32.totalorder %s1331_s20, %s1327_s19 }
   0x6   : > { %p33_p2 = scmp.eq.s32.totalorder %s1335_s21, 0  ;;  %p38_p3 = scmp.ne.s32.totalorder %s1327_s19, %s1323_s18 }
   0x7   : > { %s1411_s26 = scalar_select %p23_p0, %s1331_s20, %s25_s25  }
   0x8   : > { %p34_p4 = por %p33_p2, %p32_p1  ;;  %p39_p5 = scmp.eq.s32.totalorder %s1398_s22, 0 }
   0x9   : > { %p1052_p6 = scmp.lt.s32.totalorder %s1335_s21, 2  ;;  %s184_s28 = sand.u32 1, %s1331_s20  }
   0xa   : > { %p1415_p7 = por %p39_p5, %p38_p3  ;;  %s921_s29 = sshll.u32 %s184_s28, 5 }
   0xb   : > { %s1028_s30 = sshll.u32 %s1335_s21, 9  ;;  %s188_s9 = scalar_lea.vmem [#allocation2], %s921_s29 }
   0xc   : > { %s1424_s8 = scalar_lea.hbm %s1921_s0, %s1028_s30  ;;  %s195_s10 = sshll.u32 %s188_s9, 4  ;;  %s1426_s10 = int_to_ptr.vmem [resolvable:$true] %s195_s10 }
   0xd   : > { %p1428_p8 = pnand %p1052_p6, %p34_p4  ;;  %s1433_s12 = scalar_lea.sflag [#allocation3], %s184_s28 }
   0xe   : > { %s1271_s13 = scalar_lea.hbm %s1424_s8, 512  ;;  %s1276_s16 = scalar_lea.hbm %s1921_s0, 1024 }
   0xf   : > { %p1272_p10 = scmp.ne.s32.totalorder %s1424_s8, %s1271_s13  ;;  %p1273_p11 = pneg %p1428_p8 }
  0x10   : > { %p1277_p0 = scmp.lt.u32.totalorder %s1424_s8, %s1921_s0  ;;  %p1278_p1 = scmp.lt.u32.totalorder %s1276_s16, %s1271_s13 }
  0x11   : > { %p1274_p12 = pnand %p1273_p11, %p1272_p10  ;;  %p1280_p3 = scmp.lt.u32.totalorder %s1271_s13, %s1424_s8 }
  0x12   : > { %p1279_p2 = por %p1278_p1, %p1277_p0 }
  0x13   : > { %p1275_p13 = pneg %p1274_p12 }
  0x14   : > { %p1281_p4 = por %p1280_p3, %p1279_p2 }
  0x16   : > { %p1282_p5 = pnand %p1281_p4, %p1275_p13 }
  0x18   : > { %1285 = shalt.err (!%p1282_p5)
}
  0x19   : > { %s1286_s24 = scalar_lea.vmem %s1426_s10, 512  ;;  %s1337_s25 = smov [#allocation2]  }
  0x1a   : > { %p1287_p6 = scmp.ne.s32.totalorder %s1426_s10, %s1286_s24  ;;  %s1291_s28 = sshll.u32 %s1337_s25, 4  ;;  %s1292_s28 = int_to_ptr.vmem [resolvable:$false] %s1291_s28 }
  0x1b   : > { %s1293_s29 = scalar_lea.vmem %s1292_s28, 1024  ;;  %p1294_p9 = scmp.lt.s32.totalorder %s1426_s10, %s1292_s28 }
  0x1c   : > { %p1289_p10 = pnand %p1287_p6, %p1273_p11  ;;  %p1295_p0 = scmp.lt.s32.totalorder %s1293_s29, %s1286_s24 }
  0x1e   : > { %p1290_p12 = pneg %p1289_p10  ;;  %p1296_p1 = por %p1295_p0, %p1294_p9 }
  0x20   : > { %p1297_p2 = pnand %p1296_p1, %p1290_p12 }
  0x22   : > { %1300 = shalt.err (!%p1297_p2)
}
  0x23   : > { %s1338_s30 = smov 128   ;;  %s1339_s6 = smov 8  }
  0x24   : > { %1051 = dma.hbm_to_vmem [thread:$0]  (!%p1428_p8), %s1424_s8, 512, %s1426_s10, %s1433_s12, %s1338_s30, %s1338_s30, %s1339_s6  }
  0x25   : > { %p203_p11 = scmp.lt.s32.totalorder %s1335_s21, 3  ;;  %p1929_p13 = scmp.ge.s32.totalorder %s1335_s21, 1 }
  0x27   : > { %p204_p3 = pnand %p1929_p13, %p203_p11 }
  0x28   : > { %s209_s7 = sand.u32 (!%p204_p3), 1, %s1327_s19  }
  0x29   : > { %207 = sbr.rel (%p204_p3) target bundleno = 696 (0x2b8), region = 40  ;;  %s925_s9 = sshll.u32 (!%p204_p3), %s209_s7, 5 }
  0x2a   : > { %s210_s13 = scalar_lea.sflag (!%p204_p3), [#allocation3], %s209_s7  ;;  %s213_s14 = scalar_lea.vmem (!%p204_p3), [#allocation2], %s925_s9 }
  0x30   : > { %1318 = dma.done.wait (%p1415_p7), %s210_s13, 512  }
  0x31   : > { %1320 = vsyncadd (%p1415_p7), %s210_s13, 4294966784  ;;  %v1469_v0 = vld [vmem:[%s213_s14 + $0x10] sm:$0xff]  ;;  %v1471_v1 = vld [vmem:[%s213_s14 + $0x18] sm:$0xff]  ;;  %s1340_s21 = smov 17   ;;  %s1341_s27 = smov 16   ;;  %v1348_v21 = vmov 0   ;;  %v258_v28 = vlaneseq }
  0x32   : > { %v1473_v2 = vld [vmem:[%s213_s14] sm:$0xff]  ;;  %v254_v3 = vunpack.c.l.bf16 %v1469_v0  ;;  %v256_v4 = vunpack.c.l.bf16 %v1471_v1  ;;  %v1477_v5 = vld [vmem:[%s213_s14 + $0x8] sm:$0xff]  ;;  %v255_v7 = vunpack.c.h.bf16 %v1469_v0  ;;  %v257_v9 = vunpack.c.h.bf16 %v1471_v1  ;;  %s1342_s8 = smov 15   ;;  %s1343_s10 = smov 1   ;;  %749 = vmatprep.mubr.bf16.mxu1 %v1348_v21  ;;  %1257 = vset.pattern.permute.xlu1 %v1348_v21  ;;  %v605_v24 = vld [vmem:[%s1923_s2 + $0x10] sm:$0xff] }
  0x33   : > { %v250_v6 = vunpack.c.l.bf16 %v1473_v2  ;;  %v252_v8 = vunpack.c.l.bf16 %v1477_v5  ;;  %v251_v10 = vunpack.c.h.bf16 %v1473_v2  ;;  %v253_v11 = vunpack.c.h.bf16 %v1477_v5  ;;  %s1344_s11 = smov 127   ;;  %s1345_s12 = smov 113   ;;  %v1264_v20 = vld [vmem:[%s1922_s1 + $0x4] ss:$12 sps:$4 sm:$0xff]   ;;  %1256 = vset.pattern.permute.xlu0 %v1348_v21  ;;  %v604_v22 = vld [vmem:[%s1923_s2 + $0x8] sm:$0xff]  ;;  %v606_v25 = vld [vmem:[%s1923_s2 + $0x18] sm:$0xff] }
  0x34   : > { %v1106_v12 = vpack.i.bf16 %v256_v4, %v254_v3  ;;  %v1111_v14 = vpack.i.bf16 %v257_v9, %v255_v7  ;;  %v929_v16 = vcombine.high %v1473_v2, %v1477_v5  ;;  %v928_v17 = vcombine.low %v1473_v2, %v1477_v5  ;;  %s1346_s15 = smov 112   ;;  %s1347_s16 = smov 111   ;;  %696 = vmatprep.mubr.bf16.mxu0 %v1264_v20  ;;  %v603_v23 = vld [vmem:[%s1923_s2] sm:$0xff]  ;;  %v785_v27 = vld [vmem:[%s1925_s4 + $0x8] sm:$0xf] }
  0x35   : > { %v1096_v13 = vpack.i.bf16 %v252_v8, %v250_v6  ;;  %v1101_v15 = vpack.i.bf16 %v253_v11, %v251_v10  ;;  %v931_v18 = vcombine.high %v1469_v0, %v1471_v1  ;;  %v930_v19 = vcombine.low %v1469_v0, %v1471_v1  ;;  %v784_v26 = vld [vmem:[%s1925_s4] sm:$0xff]  ;;  %p240_p7 = scmp.lt.s32.totalorder %s1398_s22, 1 }
  0x36   : > { %1107 = vrot.lane.b32.xlu1 %v1106_v12, %s1340_s21  ;;  %v1517_v29 = vand.u32 127, %v258_v28 }
  0x37   : > { %1097 = vrot.lane.b32.xlu0 %v1096_v13, %s1340_s21  ;;  %s1963_s22 = smov (!%p240_p7, %s1398_s22), 1 }
  0x38   : > { %v1520_v30 = vadd.s32 128, %v1517_v29  ;;  %v261_v32 = vand.u32 15, %v1517_v29  ;;  %vm288_vm0 = vcmp.ge.s32.totalorder %v1517_v29, 16  ;;  %vm279_vm2 = vcmp.lt.s32.totalorder %v1517_v29, 17  ;;  %s1029_s30 = sshll.u32 %s1963_s22, 5 }
  0x39   : > { %vm322_vm4 = vcmp.lt.s32.totalorder %v1517_v29, 16  ;;  %vm359_vm8 = vcmp.lt.s32.totalorder %v1517_v29, 15  ;;  %vm1607_vm9 = vmpackc.low %vm288_vm0, %vm288_vm0  ;;  %vm400_vm14 = vcmp.lt.s32.totalorder %v1517_v29, 1  ;;  %s244_s9 = scalar_lea.vmem %s1926_s5, %s1029_s30 }
  0x3a   : > { %1112 = vrot.lane.b32.xlu1 %v1111_v14, %s1340_s21  ;;  %v262_v34 = vand.u32 15, %v1520_v30  ;;  %vm1527_vm1 = vcmp.ge.s32.totalorder %v261_v32, 1  ;;  %vm1623_vm11 = vcmp.lt.s32.totalorder %v261_v32, 15 }
  0x3b   : > { %1102 = vrot.lane.b32.xlu0 %v1101_v15, %s1340_s21  ;;  %vm1543_vm5 = vmand %vm288_vm0, %vm1527_vm1 }
  0x3c   : > { %vm1534_vm3 = vcmp.ge.s32.totalorder %v262_v34, 1  ;;  %vm941_vm7 = vmpackc.low %vm1543_vm5, %vm1543_vm5  ;;  %vm1613_vm10 = vcmp.lt.s32.totalorder %v262_v34, 15  ;;  %vm515_vm5 = vcmp.lt.s32.totalorder %v1517_v29, 112 }
  0x3d   : > { %vm1558_vm6 = vmpackc.low %vm1534_vm3, %vm1534_vm3 }
  0x3e   : > { %1122 = vrot.lane.b32.xlu1 %v1101_v15, %s1341_s27  ;;  %vm1636_vm12 = vmpackc.low %vm1613_vm10, %vm1613_vm10 }
  0x3f   : > { %1117 = vrot.lane.b32.xlu0 %v1096_v13, %s1341_s27  ;;  %vm1644_vm13 = vmand %vm288_vm0, %vm1623_vm11 }
  0x40   : > { %vm959_vm15 = vmpackc.low %vm1644_vm13, %vm1644_vm13 }
  0x41   : > { %vm1697_vm0 = vmpackc.low %vm1527_vm1, %vm1527_vm1  ;;  %vm437_vm1 = vcmp.lt.s32.totalorder %v1517_v29, 127 }
  0x42   : > { %1132 = vrot.lane.b32.xlu1 %v1111_v14, %s1341_s27 }
  0x43   : > { %1127 = vrot.lane.b32.xlu0 %v1106_v12, %s1341_s27 }
  0x46   : > { %1142 = vrot.lane.b32.xlu1 %v1101_v15, %s1342_s8 }
  0x47   : > { %1137 = vrot.lane.b32.xlu0 %v1096_v13, %s1342_s8 }
  0x4a   : > { %1152 = vrot.lane.b32.xlu1 %v1111_v14, %s1342_s8 }
  0x4b   : > { %1147 = vrot.lane.b32.xlu0 %v1106_v12, %s1342_s8 }
  0x4e   : > { %1162 = vrot.lane.b32.xlu1 %v1101_v15, %s1343_s10 }
  0x4f   : > { %1157 = vrot.lane.b32.xlu0 %v1096_v13, %s1343_s10 }
  0x52   : > { %1172 = vrot.lane.b32.xlu1 %v1111_v14, %s1343_s10 }
  0x53   : > { %1167 = vrot.lane.b32.xlu0 %v1106_v12, %s1343_s10 }
  0x56   : > { %1182 = vrot.lane.b32.xlu1 %v1101_v15, %s1344_s11 }
  0x57   : > { %1177 = vrot.lane.b32.xlu0 %v1096_v13, %s1344_s11 }
  0x5a   : > { %1192 = vrot.lane.b32.xlu1 %v1111_v14, %s1344_s11 }
  0x5b   : > { %1187 = vrot.lane.b32.xlu0 %v1106_v12, %s1344_s11 }
  0x5e   : > { %1202 = vrot.lane.b32.xlu1 %v1101_v15, %s1345_s12 }
  0x5f   : > { %1197 = vrot.lane.b32.xlu0 %v1096_v13, %s1345_s12 }
  0x62   : > { %1212 = vrot.lane.b32.xlu1 %v1111_v14, %s1345_s12 }
  0x63   : > { %1207 = vrot.lane.b32.xlu0 %v1106_v12, %s1345_s12 }
  0x66   : > { %1222 = vrot.lane.b32.xlu1 %v1101_v15, %s1346_s15 }
  0x67   : > { %1217 = vrot.lane.b32.xlu0 %v1096_v13, %s1346_s15 }
  0x6a   : > { %1232 = vrot.lane.b32.xlu1 %v1101_v15, %s1347_s16 }
  0x6b   : > { %1227 = vrot.lane.b32.xlu0 %v1096_v13, %s1347_s16 }
  0x6e   : > { %1242 = vrot.lane.b32.xlu1 %v1111_v14, %s1346_s15 }
  0x6f   : > { %1237 = vrot.lane.b32.xlu0 %v1106_v12, %s1346_s15 }
  0x72   : > { %1252 = vrot.lane.b32.xlu1 %v1111_v14, %s1347_s16 }
  0x73   : > { %1247 = vrot.lane.b32.xlu0 %v1106_v12, %s1347_s16 }
  0x76   : > { %614 = vperm.xlu1 %1257, %v604_v22  }
  0x77   : > { %609 = vperm.xlu0 %1256, %v603_v23  }
  0x7a   : > { %619 = vperm.xlu1 %1257, %v605_v24  }
  0x7b   : > { %624 = vperm.xlu0 %1256, %v606_v25  }
  0x7e   : > { %788 = vperm.xlu1 %1257, %v784_v26  }
  0x7f   : > { %793 = vperm.xlu0 %1256, %v785_v27  }
  0xa8   : > { %v1108_v31 = vpop.permute.xlu1 %1107 }
  0xa9   : > { %v1098_v33 = vpop.permute.xlu0 %1097  ;;  %v1110_v35 = vunpack.i.h.bf16 %v1108_v31  ;;  %v1109_v36 = vunpack.i.l.bf16 %v1108_v31 }
  0xaa   : > { %v1100_v43 = vunpack.i.h.bf16 %v1098_v33  ;;  %v1099_v44 = vunpack.i.l.bf16 %v1098_v33 }
  0xac   : > { %v1113_v37 = vpop.permute.xlu1 %1112 }
  0xad   : > { %v1115_v39 = vunpack.i.h.bf16 %v1113_v37  ;;  %v1114_v40 = vunpack.i.l.bf16 %v1113_v37  ;;  %v1103_v41 = vpop.permute.xlu0 %1102 }
  0xae   : > { %v1105_v45 = vunpack.i.h.bf16 %v1103_v41  ;;  %v1104_v46 = vunpack.i.l.bf16 %v1103_v41 }
  0xaf   : > { %v282_v48 = vsel %vm279_vm2, %v1109_v36, %v1114_v40  ;;  %v283_v49 = vsel %vm279_vm2, %v1110_v35, %v1115_v39  ;;  %v286_v62 = vsel %vm279_vm2, %v1114_v40, %v1109_v36  ;;  %v287_v3 = vsel %vm279_vm2, %v1115_v39, %v1110_v35 }
  0xb0   : > { %v280_v50 = vsel %vm279_vm2, %v1099_v44, %v1104_v46  ;;  %v281_v51 = vsel %vm279_vm2, %v1100_v43, %v1105_v45  ;;  %v1123_v53 = vpop.permute.xlu1 %1122  ;;  %v284_v58 = vsel %vm279_vm2, %v1104_v46, %v1099_v44  ;;  %v285_v61 = vsel %vm279_vm2, %v1105_v45, %v1100_v43 }
  0xb1   : > { %v939_v54 = vpack.c.bf16 %v281_v51, %v280_v50  ;;  %v1125_v55 = vunpack.i.h.bf16 %v1123_v53  ;;  %v1124_v56 = vunpack.i.l.bf16 %v1123_v53  ;;  %v1118_v57 = vpop.permute.xlu0 %1117  ;;  %v942_v63 = vpack.c.bf16 %v285_v61, %v284_v58 }
  0xb2   : > { %v1120_v59 = vunpack.i.h.bf16 %v1118_v57  ;;  %v1119_v60 = vunpack.i.l.bf16 %v1118_v57  ;;  %v945_v4 = vpack.c.bf16 %v283_v49, %v282_v48  ;;  %v948_v22 = vpack.c.bf16 %v287_v3, %v286_v62 }
  0xb3   : > { %940 = vmatprep.subr.msk.bf16.mxu0 %vm1558_vm6, %v939_v54  ;;  %vm474_vm2 = vcmp.lt.s32.totalorder %v1517_v29, 113 }
  0xb4   : > { %v1133_v6 = vpop.permute.xlu1 %1132  ;;  %v323_v7 = vsel %vm322_vm4, %v1119_v60, %v1124_v56  ;;  %v324_v8 = vsel %vm322_vm4, %v1120_v59, %v1125_v55  ;;  %v328_v9 = vsel %vm322_vm4, %v1125_v55, %v1120_v59  ;;  %943 = vmatpush1.bf16.msk.msra.mxu0 %vm941_vm7, %v942_v63  ;;  %v327_v13 = vsel %vm322_vm4, %v1124_v56, %v1119_v60 }
  0xb5   : > { %v1135_v10 = vunpack.i.h.bf16 %v1133_v6  ;;  %v1134_v11 = vunpack.i.l.bf16 %v1133_v6  ;;  %v1128_v12 = vpop.permute.xlu0 %1127  ;;  %946 = vmatprep.subr.msk.bf16.mxu0 %vm1558_vm6, %v945_v4  ;;  %v340_v20 = vpack.c.bf16 %v324_v8, %v323_v7  ;;  %v951_v26 = vpack.c.bf16 %v328_v9, %v327_v13 }
  0xb6   : > { %v1130_v14 = vunpack.i.h.bf16 %v1128_v12  ;;  %v1129_v15 = vunpack.i.l.bf16 %v1128_v12 }
  0xb8   : > { %v1143_v23 = vpop.permute.xlu1 %1142  ;;  %v325_v24 = vsel %vm322_vm4, %v1129_v15, %v1134_v11  ;;  %v326_v25 = vsel %vm322_vm4, %v1130_v14, %v1135_v10  ;;  %v330_v27 = vsel %vm322_vm4, %v1135_v10, %v1130_v14  ;;  %949 = vmatpush1.bf16.msk.msra.mxu0 %vm941_vm7, %v948_v22  ;;  %v329_v35 = vsel %vm322_vm4, %v1134_v11, %v1129_v15 }
  0xb9   : > { %v1145_v28 = vunpack.i.h.bf16 %v1143_v23  ;;  %v1144_v31 = vunpack.i.l.bf16 %v1143_v23  ;;  %v1138_v33 = vpop.permute.xlu0 %1137  ;;  %668 = vmatprep.subr.bf16.mxu0 %v340_v20  ;;  %v342_v40 = vpack.c.bf16 %v326_v25, %v325_v24  ;;  %v954_v47 = vpack.c.bf16 %v330_v27, %v329_v35 }
  0xba   : > { %v1140_v36 = vunpack.i.h.bf16 %v1138_v33  ;;  %v1139_v37 = vunpack.i.l.bf16 %v1138_v33  ;;  %vm484_vm4 = vcmp.lt.s32.totalorder %v1520_v30, 240  ;;  %vm552_vm7 = vcmp.lt.s32.totalorder %v1517_v29, 111  ;;  %v1266_v29 = vld [vmem:[%s1922_s1 + $0x1c] ss:$12 sps:$4 sm:$0xff]  }
  0xbc   : > { %v361_v43 = vsel %vm359_vm8, %v1140_v36, %v1145_v28  ;;  %v360_v44 = vsel %vm359_vm8, %v1139_v37, %v1144_v31  ;;  %v1153_v45 = vpop.permute.xlu1 %1152  ;;  %v365_v34 = vsel %vm359_vm8, %v1145_v28, %v1140_v36  ;;  %952 = vmatpush1.bf16.msk.msra.mxu0 %vm1607_vm9, %v951_v26  ;;  %v364_v51 = vsel %vm359_vm8, %v1144_v31, %v1139_v37 }
  0xbd   : > { %v1155_v48 = vunpack.i.h.bf16 %v1153_v45  ;;  %v1154_v49 = vunpack.i.l.bf16 %v1153_v45  ;;  %v1148_v50 = vpop.permute.xlu0 %1147  ;;  %v957_v53 = vpack.c.bf16 %v361_v43, %v360_v44  ;;  %670 = vmatprep.subr.bf16.mxu0 %v342_v40  ;;  %v960_v60 = vpack.c.bf16 %v365_v34, %v364_v51 }
  0xbe   : > { %v1150_v54 = vunpack.i.h.bf16 %v1148_v50  ;;  %v1149_v32 = vunpack.i.l.bf16 %v1148_v50 }
  0xc0   : > { %v363_v57 = vsel %vm359_vm8, %v1150_v54, %v1155_v48  ;;  %v362_v58 = vsel %vm359_vm8, %v1149_v32, %v1154_v49  ;;  %v1163_v59 = vpop.permute.xlu1 %1162  ;;  %v367_v61 = vsel %vm359_vm8, %v1155_v48, %v1150_v54  ;;  %955 = vmatpush1.bf16.msk.msra.mxu0 %vm1607_vm9, %v954_v47  ;;  %v366_v4 = vsel %vm359_vm8, %v1154_v49, %v1149_v32  ;;  %vm1769_vm8 = vmand %vm484_vm4, %vm1534_vm3 }
  0xc1   : > { %v1165_v62 = vunpack.i.h.bf16 %v1163_v59  ;;  %v1164_v63 = vunpack.i.l.bf16 %v1163_v59  ;;  %v1158_v3 = vpop.permute.xlu0 %1157  ;;  %v963_v6 = vpack.c.bf16 %v363_v57, %v362_v58  ;;  %958 = vmatprep.subr.msk.bf16.mxu0 %vm1636_vm12, %v957_v53  ;;  %v966_v12 = vpack.c.bf16 %v367_v61, %v366_v4  ;;  %vm1781_vm9 = vmand %vm484_vm4, %vm1613_vm10 }
  0xc2   : > { %v1160_v7 = vunpack.i.h.bf16 %v1158_v3  ;;  %v1159_v8 = vunpack.i.l.bf16 %v1158_v3  ;;  %vm992_vm3 = vmpackc.low %vm1769_vm8, %vm1769_vm8 }
  0xc3   : > { %vm1010_vm10 = vmpackc.low %vm1781_vm9, %vm1781_vm9 }
  0xc4   : > { %v402_v9 = vsel %vm400_vm14, %v1160_v7, %v1165_v62  ;;  %v401_v10 = vsel %vm400_vm14, %v1159_v8, %v1164_v63  ;;  %v1173_v11 = vpop.permute.xlu1 %1172  ;;  %v406_v13 = vsel %vm400_vm14, %v1165_v62, %v1160_v7  ;;  %961 = vmatpush1.bf16.msk.msra.mxu0 %vm959_vm15, %v960_v60  ;;  %v405_v22 = vsel %vm400_vm14, %v1164_v63, %v1159_v8 }
  0xc5   : > { %v1175_v14 = vunpack.i.h.bf16 %v1173_v11  ;;  %v1174_v15 = vunpack.i.l.bf16 %v1173_v11  ;;  %v1168_v20 = vpop.permute.xlu0 %1167  ;;  %v969_v23 = vpack.c.bf16 %v402_v9, %v401_v10  ;;  %964 = vmatprep.subr.msk.bf16.mxu0 %vm1636_vm12, %v963_v6  ;;  %v972_v31 = vpack.c.bf16 %v406_v13, %v405_v22  ;;  %v1268_v6 = vld [vmem:[%s1922_s1 + $0x20] ss:$12 sps:$4 sm:$0xff]  }
  0xc6   : > { %v1170_v24 = vunpack.i.h.bf16 %v1168_v20  ;;  %v1169_v25 = vunpack.i.l.bf16 %v1168_v20 }
  0xc8   : > { %v404_v26 = vsel %vm400_vm14, %v1170_v24, %v1175_v14  ;;  %v403_v27 = vsel %vm400_vm14, %v1169_v25, %v1174_v15  ;;  %v1183_v28 = vpop.permute.xlu1 %1182  ;;  %967 = vmatpush1.bf16.msk.msra.mxu0 %vm959_vm15, %v966_v12  ;;  %v408_v35 = vsel %vm400_vm14, %v1175_v14, %v1170_v24  ;;  %v407_v36 = vsel %vm400_vm14, %v1174_v15, %v1169_v25  ;;  %v1269_v12 = vld [vmem:[%s1922_s1 + $0x18] ss:$12 sps:$4 sm:$0xff]  }
  0xc9   : > { %v1178_v33 = vpop.permute.xlu0 %1177  ;;  %v975_v37 = vpack.c.bf16 %v404_v26, %v403_v27  ;;  %970 = vmatprep.subr.msk.bf16.mxu0 %vm1558_vm6, %v969_v23  ;;  %v978_v43 = vpack.c.bf16 %v408_v35, %v407_v36  ;;  %v1185_v47 = vunpack.i.h.bf16 %v1183_v28  ;;  %v1184_v34 = vunpack.i.l.bf16 %v1183_v28 }
  0xca   : > { %v1180_v48 = vunpack.i.h.bf16 %v1178_v33  ;;  %v1179_v49 = vunpack.i.l.bf16 %v1178_v33 }
  0xcc   : > { %v1193_v40 = vpop.permute.xlu1 %1192  ;;  %973 = vmatpush1.bf16.msk.msra.mxu0 %vm1697_vm0, %v972_v31  ;;  %v443_v32 = vsel %vm437_vm1, %v1185_v47, %v1180_v48  ;;  %v442_v56 = vsel %vm437_vm1, %v1184_v34, %v1179_v49  ;;  %v438_v62 = vsel %vm437_vm1, %v1179_v49, %v1184_v34 }
  0xcd   : > { %v1188_v44 = vpop.permute.xlu0 %1187  ;;  %976 = vmatprep.subr.msk.bf16.mxu0 %vm1558_vm6, %v975_v37  ;;  %v1195_v50 = vunpack.i.h.bf16 %v1193_v40  ;;  %v1194_v51 = vunpack.i.l.bf16 %v1193_v40  ;;  %v981_v2 = vpack.c.bf16 %v443_v32, %v442_v56  ;;  %vm1752_vm6 = vmpackc.low %vm1623_vm11, %vm1623_vm11 }
  0xce   : > { %v1190_v53 = vunpack.i.h.bf16 %v1188_v44  ;;  %v1189_v52 = vunpack.i.l.bf16 %v1188_v44  ;;  %vm1849_vm11 = vmpackc.low %vm484_vm4, %vm484_vm4 }
  0xd0   : > { %v1203_v45 = vpop.permute.xlu1 %1202  ;;  %979 = vmatpush1.bf16.msk.msra.mxu0 %vm1697_vm0, %v978_v43  ;;  %v445_v5 = vsel %vm437_vm1, %v1195_v50, %v1190_v53  ;;  %v441_v3 = vsel %vm437_vm1, %v1190_v53, %v1195_v50 }
  0xd1   : > { %v1198_v38 = vpop.permute.xlu0 %1197  ;;  %680 = vmatprep.subr.bf16.mxu0 %v929_v16  ;;  %v439_v16 = vsel %vm437_vm1, %v1180_v48, %v1185_v47  ;;  %v1205_v58 = vunpack.i.h.bf16 %v1203_v45  ;;  %v1204_v59 = vunpack.i.l.bf16 %v1203_v45 }
  0xd2   : > { %v1200_v60 = vunpack.i.h.bf16 %v1198_v38  ;;  %v1199_v61 = vunpack.i.l.bf16 %v1198_v38  ;;  %v984_v0 = vpack.c.bf16 %v439_v16, %v438_v62 }
  0xd4   : > { %v1711_v54 = vpop.permute.xlu1 %1212  ;;  %681 = vmatpush1.bf16.msra.mxu0 %v928_v17  ;;  %v444_v17 = vsel %vm437_vm1, %v1194_v51, %v1189_v52  ;;  %v479_v7 = vsel %vm474_vm2, %v1204_v59, %v1199_v61  ;;  %v476_v9 = vsel %vm474_vm2, %v1200_v60, %v1205_v58  ;;  %v475_v23 = vsel %vm474_vm2, %v1199_v61, %v1204_v59 }
  0xd5   : > { %v1720_v57 = vpop.permute.xlu0 %1207  ;;  %682 = vmatprep.subr.bf16.mxu0 %v931_v18  ;;  %v440_v18 = vsel %vm437_vm1, %v1189_v52, %v1194_v51  ;;  %v987_v1 = vpack.c.bf16 %v445_v5, %v444_v17  ;;  %v1215_v46 = vunpack.i.h.bf16 %v1711_v54  ;;  %v1214_v10 = vunpack.i.l.bf16 %v1711_v54 }
  0xd6   : > { %v990_v8 = vpack.c.bf16 %v441_v3, %v440_v18  ;;  %v1210_v13 = vunpack.i.h.bf16 %v1720_v57  ;;  %v1209_v14 = vunpack.i.l.bf16 %v1720_v57  ;;  %v996_v34 = vpack.c.bf16 %v476_v9, %v475_v23  ;;  %v1265_v9 = vld [vmem:[%s1922_s1 + $0x8] ss:$12 sps:$4 sm:$0xff]  }
  0xd8   : > { %v1734_v63 = vpop.permute.xlu1 %1222  ;;  %683 = vmatpush1.bf16.msra.mxu0 %v930_v19  ;;  %v480_v19 = vsel %vm474_vm2, %v1205_v58, %v1200_v60  ;;  %v482_v40 = vsel %vm474_vm2, %v1215_v46, %v1210_v13  ;;  %v481_v43 = vsel %vm474_vm2, %v1214_v10, %v1209_v14  ;;  %v478_v48 = vsel %vm474_vm2, %v1210_v13, %v1215_v46 }
  0xd9   : > { %v1743_v4 = vpop.permute.xlu0 %1217  ;;  %982 = vmatprep.subr.msk.bf16.mxu0 %vm1636_vm12, %v981_v2  ;;  %v993_v24 = vpack.c.bf16 %v480_v19, %v479_v7  ;;  %v1225_v27 = vunpack.i.h.bf16 %v1734_v63  ;;  %v1224_v28 = vunpack.i.l.bf16 %v1734_v63  ;;  %v477_v49 = vsel %vm474_vm2, %v1209_v14, %v1214_v10 }
  0xda   : > { %v1220_v41 = vunpack.i.h.bf16 %v1743_v4  ;;  %v1219_v31 = vunpack.i.l.bf16 %v1743_v4  ;;  %v999_v52 = vpack.c.bf16 %v482_v40, %v481_v43  ;;  %v1002_v59 = vpack.c.bf16 %v478_v48, %v477_v49 }
  0xdc   : > { %v1233_v11 = vpop.permute.xlu1 %1232  ;;  %985 = vmatpush1.bf16.msk.msra.mxu0 %vm1752_vm6, %v984_v0  ;;  %v521_v54 = vsel %vm515_vm5, %v1225_v27, %v1220_v41  ;;  %v520_v32 = vsel %vm515_vm5, %v1224_v28, %v1219_v31  ;;  %v516_v62 = vsel %vm515_vm5, %v1219_v31, %v1224_v28  ;;  %v517_v3 = vsel %vm515_vm5, %v1220_v41, %v1225_v27 }
  0xdd   : > { %v1235_v15 = vunpack.i.h.bf16 %v1233_v11  ;;  %v1234_v20 = vunpack.i.l.bf16 %v1233_v11  ;;  %v1228_v22 = vpop.permute.xlu0 %1227  ;;  %988 = vmatprep.subr.msk.bf16.mxu0 %vm1636_vm12, %v987_v1  ;;  %v1005_v2 = vpack.c.bf16 %v521_v54, %v520_v32  ;;  %vm657_vm12 = vcmask 261120   ;;  %v1262_v11 = vld [vmem:[%s1922_s1] ss:$12 sps:$4 sm:$0xff]  }
  0xde   : > { %v1230_v25 = vunpack.i.h.bf16 %v1228_v22  ;;  %v1229_v26 = vunpack.i.l.bf16 %v1228_v22 }
  0xe0   : > { %v1243_v33 = vpop.permute.xlu1 %1242  ;;  %v557_v35 = vsel %vm552_vm7, %v1234_v20, %v1229_v26  ;;  %v558_v55 = vsel %vm552_vm7, %v1235_v15, %v1230_v25  ;;  %v553_v36 = vsel %vm552_vm7, %v1229_v26, %v1234_v20  ;;  %v554_v37 = vsel %vm552_vm7, %v1230_v25, %v1235_v15  ;;  %991 = vmatpush1.bf16.msk.msra.mxu0 %vm1752_vm6, %v990_v8 }
  0xe1   : > { %v1238_v44 = vpop.permute.xlu0 %1237  ;;  %v1011_v45 = vpack.c.bf16 %v558_v55, %v557_v35  ;;  %v1014_v47 = vpack.c.bf16 %v554_v37, %v553_v36  ;;  %994 = vmatprep.subr.msk.bf16.mxu0 %vm992_vm3, %v993_v24  ;;  %v1245_v38 = vunpack.i.h.bf16 %v1243_v33  ;;  %v1244_v50 = vunpack.i.l.bf16 %v1243_v33 }
  0xe2   : > { %v1240_v51 = vunpack.i.h.bf16 %v1238_v44  ;;  %v1239_v53 = vunpack.i.l.bf16 %v1238_v44  ;;  %v532_v8 = vpack.c.bf16 %v517_v3, %v516_v62 }
  0xe3   : > { %1012 = vmatprep.subr.msk.bf16.mxu1 %vm1010_vm10, %v1011_v45 }
  0xe4   : > { %v1253_v56 = vpop.permute.xlu1 %1252  ;;  %1015 = vmatpush1.bf16.msk.msra.mxu1 %vm1752_vm6, %v1014_v47  ;;  %997 = vmatpush1.bf16.msk.msra.mxu0 %vm1697_vm0, %v996_v34  ;;  %v523_v5 = vsel %vm515_vm5, %v1245_v38, %v1240_v51  ;;  %v522_v17 = vsel %vm515_vm5, %v1244_v50, %v1239_v53  ;;  %v518_v39 = vsel %vm515_vm5, %v1239_v53, %v1244_v50 }
  0xe5   : > { %v1255_v57 = vunpack.i.h.bf16 %v1253_v56  ;;  %v1254_v16 = vunpack.i.l.bf16 %v1253_v56  ;;  %v1248_v58 = vpop.permute.xlu0 %1247  ;;  %1000 = vmatprep.subr.msk.bf16.mxu0 %vm992_vm3, %v999_v52  ;;  %v1008_v7 = vpack.c.bf16 %v523_v5, %v522_v17  ;;  %v519_v46 = vsel %vm515_vm5, %v1240_v51, %v1245_v38 }
  0xe6   : > { %v1250_v60 = vunpack.i.h.bf16 %v1248_v58  ;;  %v1249_v61 = vunpack.i.l.bf16 %v1248_v58  ;;  %v534_v10 = vpack.c.bf16 %v519_v46, %v518_v39 }
  0xe8   : > { %v556_v18 = vsel %vm552_vm7, %v1250_v60, %v1255_v57  ;;  %v560_v4 = vsel %vm552_vm7, %v1255_v57, %v1250_v60  ;;  %v555_v0 = vsel %vm552_vm7, %v1249_v61, %v1254_v16  ;;  %v559_v30 = vsel %vm552_vm7, %v1254_v16, %v1249_v61  ;;  %1003 = vmatpush1.bf16.msk.msra.mxu0 %vm1697_vm0, %v1002_v59 }
  0xe9   : > { %v1017_v1 = vpack.c.bf16 %v560_v4, %v559_v30  ;;  %v1020_v19 = vpack.c.bf16 %v556_v18, %v555_v0  ;;  %1006 = vmatprep.subr.msk.bf16.mxu0 %vm1849_vm11, %v1005_v2  ;;  %v1270_v18 = vld [vmem:[%s1924_s3] sm:$0x3f]  }
  0xeb   : > { %1018 = vmatprep.subr.msk.bf16.mxu1 %vm1010_vm10, %v1017_v1 }
  0xec   : > { %1021 = vmatpush1.bf16.msk.msra.mxu1 %vm1752_vm6, %v1020_v19  ;;  %693 = vmatpush1.bf16.msra.mxu0 %v532_v8 }
  0xed   : > { %1009 = vmatprep.subr.msk.bf16.mxu0 %vm1849_vm11, %v1008_v7 }
  0xef   : > { %1022 = vmatmul.mubr.msk.bf16.vlgmr.msra.gmra.mrb[0].mxu1 %vm657_vm12, %v1265_v9 }
  0xf0   : > { %759 = vmatprep.mubr.bf16.mxu1 %v1348_v21  ;;  %695 = vmatpush1.bf16.msra.mxu0 %v534_v10 }
  0xf3   : > { %697 = vmatmul.mubr.bf16.vlgmr.msra.gmra.mrb[0].mxu0 %v1262_v11 }
  0xf4   : > { %706 = vmatprep.mubr.bf16.mxu0 %v1266_v29 }
  0xf5   : > { %v615_v25 = vpop.permute.xlu1 %614 }
  0xf6   : > { %v610_v20 = vpop.permute.xlu0 %609 }
  0xf7   : > { %1023 = vmatmul.mubr.msk.bf16.gmra.mrb[4].mxu1 %vm657_vm12, %v1268_v6 }
  0xf8   : > { %836 = vmatprep.mubr.bf16.mxu1 %v1348_v21 }
  0xf9   : > { %v620_v47 = vpop.permute.xlu1 %619 }
  0xfa   : > { %v625_v53 = vpop.permute.xlu0 %624 }
  0xfb   : > { %707 = vmatmul.mubr.bf16.gmra.mrb[4].mxu0 %v1269_v12 }
  0xfd   : > { %v789_v4 = vpop.permute.xlu1 %788 }
  0xfe   : > { %v794_v19 = vpop.permute.xlu0 %793 }
 0x1c2   : > { %v751_v13 = vpop.f32.mrb[0].mxu1 }
 0x1c3   : > { %v753_v14 = vpop.f32.mrb[1].mxu1 }
 0x1c4   : > { %v755_v15 = vpop.f32.mrb[2].mxu1 }
 0x1c5   : > { %v757_v22 = vpop.f32.mrb[3].mxu1 }
 0x1c6   : > { %v698_v42 = vpop.f32.mrb[0].mxu0 }
 0x1c7   : > { %v699_v23 = vadd.f32 %v698_v42, %v610_v20  ;;  %v700_v24 = vpop.f32.mrb[1].mxu0 }
 0x1c8   : > { %v701_v26 = vadd.f32 %v700_v24, %v610_v20  ;;  %v702_v27 = vpop.f32.mrb[2].mxu0 }
 0x1c9   : > { %v752_v28 = vadd.f32 %v751_v13, %v699_v23  ;;  %v703_v41 = vadd.f32 %v702_v27, %v615_v25  ;;  %v704_v31 = vpop.f32.mrb[3].mxu0 }
 0x1ca   : > { %v761_v33 = vpop.f32.mrb[4].mxu1  ;;  %v754_v35 = vadd.f32 %v753_v14, %v701_v26  ;;  %v705_v55 = vadd.f32 %v704_v31, %v615_v25 }
 0x1cb   : > { %v763_v36 = vpop.f32.mrb[5].mxu1  ;;  %v756_v21 = vadd.f32 %v755_v15, %v703_v41  ;;  %v770_v44 = vmax.f32 %v752_v28, 0.0 }
 0x1cc   : > { %v765_v37 = vpop.f32.mrb[6].mxu1  ;;  %v758_v40 = vadd.f32 %v757_v22, %v705_v55  ;;  %v771_v34 = vmax.f32 %v754_v35, 0.0 }
 0x1cd   : > { %v767_v43 = vpop.f32.mrb[7].mxu1  ;;  %v772_v45 = vmax.f32 %v756_v21, 0.0 }
 0x1ce   : > { %v773_v48 = vmax.f32 %v758_v40, 0.0  ;;  %v708_v49 = vpop.f32.mrb[4].mxu0 }
 0x1cf   : > { %v780_v38 = vpack.c.bf16 %v772_v45, %v770_v44  ;;  %v709_v50 = vadd.f32 %v708_v49, %v620_v47  ;;  %v710_v51 = vpop.f32.mrb[5].mxu0 }
 0x1d0   : > { %v711_v52 = vadd.f32 %v710_v51, %v620_v47  ;;  %v712_v54 = vpop.f32.mrb[6].mxu0  ;;  %v781_v32 = vpack.c.bf16 %v773_v48, %v771_v34 }
 0x1d1   : > { %v762_v56 = vadd.f32 %v761_v33, %v709_v50  ;;  %v713_v57 = vadd.f32 %v712_v54, %v625_v53  ;;  %v714_v16 = vpop.f32.mrb[7].mxu0 }
 0x1d2   : > { %v764_v58 = vadd.f32 %v763_v36, %v711_v52  ;;  %v715_v59 = vadd.f32 %v714_v16, %v625_v53  ;;  %804 = vmatprep.subr.bf16.mxu1 %v781_v32 }
 0x1d3   : > { %v766_v60 = vadd.f32 %v765_v37, %v713_v57  ;;  %805 = vmatpush1.bf16.msra.mxu1 %v780_v38  ;;  %v774_v62 = vmax.f32 %v762_v56, 0.0 }
 0x1d4   : > { %v768_v61 = vadd.f32 %v767_v43, %v715_v59  ;;  %v775_v5 = vmax.f32 %v764_v58, 0.0 }
 0x1d5   : > { %v776_v2 = vmax.f32 %v766_v60, 0.0 }
 0x1d6   : > { %v777_v17 = vmax.f32 %v768_v61, 0.0 }
 0x1d7   : > { %v782_v63 = vpack.c.bf16 %v776_v2, %v774_v62 }
 0x1d8   : > { %v783_v3 = vpack.c.bf16 %v777_v17, %v775_v5 }
 0x1da   : > { %806 = vmatprep.subr.bf16.mxu1 %v783_v3 }
 0x1db   : > { %807 = vmatpush1.bf16.msra.mxu1 %v782_v63 }
 0x1de   : > { %1025 = vmatmul.mubr.msk.bf16.vlgmr.msra.gmra.mrb[8].mxu1 %vm657_vm12, %v1270_v18 }
 0x2b1   : > { %v838_v0 = vpop.f32.mrb[8].mxu1 }
 0x2b2   : > { %v839_v30 = vadd.f32 %v838_v0, %v789_v4  ;;  %v840_v1 = vpop.f32.mrb[9].mxu1 }
 0x2b3   : > { %v841_v7 = vadd.f32 %v840_v1, %v789_v4  ;;  %v842_v8 = vpop.f32.mrb[10].mxu1 }
 0x2b4   : > { %847 = vst [vmem:[%s244_s9] sm:$0xff] %v839_v30  ;;  %v843_v9 = vadd.f32 %v842_v8, %v794_v19  ;;  %v844_v39 = vpop.f32.mrb[11].mxu1 }
 0x2b5   : > { %848 = vst [vmem:[%s244_s9 + $0x8] sm:$0xff] %v841_v7  ;;  %v845_v46 = vadd.f32 %v844_v39, %v794_v19 }
 0x2b6   : > { %849 = vst [vmem:[%s244_s9 + $0x10] sm:$0xf] %v843_v9 }
 0x2b7   : > { %850 = vst [vmem:[%s244_s9 + $0x18] sm:$0xf] %v845_v46 }
 0x2b8 PF: > { %p15_p8 = scmp.ge.s32.totalorder %s1401_s23, 4   ;;  %s1958_s18 = smov %s1327_s19 }
 0x2b9   : > { %s1959_s19 = smov %s1331_s20  ;;  %s1960_s20 = smov %s1411_s26 }
 0x2ba   : > { %s1961_s21 = smov %s1401_s23  ;;  %17 = sbr.rel (!%p15_p8) target bundleno = 3 (0x3), region = 80 }
 0x2c1   :  { %872 = vsyncpa [#allocation3], 1 }
 0x2c2   :  { %874 = vsyncpa [#allocation3 + $0x1], 1 }

</bundles_post_ra>
